<compile_context>
chip_gen: v6e
topology: v6e:2x2x1
jax: 0.10.0
libtpu: 0.0.40
codegen_flags: <defaults>
</compile_context>

<pallas_src>
import jax
import jax.numpy as jnp
from jax.experimental import pallas as pl
from jax.experimental.pallas import tpu as pltpu


def _upsample_matrix(out_size: int, in_size: int) -> jnp.ndarray:
    """1-D bilinear interpolation matrix with align_corners=True semantics."""
    if in_size == 1:
        return jnp.ones((out_size, 1), dtype=jnp.float32)
    if out_size == 1:
        return jnp.zeros((1, in_size), dtype=jnp.float32).at[0, 0].set(1.0)
    idx = jnp.arange(out_size, dtype=jnp.float32)
    src = idx * (in_size - 1) / (out_size - 1)
    lo = jnp.clip(jnp.floor(src).astype(jnp.int32), 0, in_size - 2)
    frac = src - lo.astype(jnp.float32)
    rows = jnp.arange(out_size)
    m = jnp.zeros((out_size, in_size), dtype=jnp.float32)
    m = m.at[rows, lo].add(1.0 - frac)
    m = m.at[rows, lo + 1].add(frac)
    return m


def _pick_tile_hw(hw: int, sum_hw: int, budget_bytes: int = 8 << 20) -> int:
    """Largest multiple-of-128 tile of the output HW axis that divides HW and keeps
    the fused K block (sum_hw x tile x 4B) under a per-buffer VMEM budget."""
    if hw % 128 != 0:
        return hw  # full-extent block (allowed when equal to the array dim)
    cap = max(128, budget_bytes // (4 * max(sum_hw, 1)))
    if hw <= cap:
        return hw
    best, t = 128, 256
    while t <= cap:
        if hw % t == 0:
            best = t
        t += 128
    return best


def _fc_kernel(x1_ref, x2_ref, x3_ref, x4_ref, x5_ref,
               w1_ref, w2_ref, w3_ref, w4_ref, w5_ref,
               kt_ref, o_ref):
    # Full-resolution 1x1 conv on this HW tile: (2, C1) @ (C1, TILE) -> (2, TILE).
    acc = jnp.dot(w1_ref[...], x1_ref[0], preferred_element_type=jnp.float32)

    # 1x1 convs at the coarse resolutions: (2, C_i) @ (C_i, HW_i) -> (2, HW_i).
    y2 = jnp.dot(w2_ref[...], x2_ref[0], preferred_element_type=jnp.float32)
    y3 = jnp.dot(w3_ref[...], x3_ref[0], preferred_element_type=jnp.float32)
    y4 = jnp.dot(w4_ref[...], x4_ref[0], preferred_element_type=jnp.float32)
    y5 = jnp.dot(w5_ref[...], x5_ref[0], preferred_element_type=jnp.float32)

    # Fused bilinear upsample of all coarse levels in a single lane-dense matmul:
    # (2, sum HW_i) @ (sum HW_i, TILE) -> (2, TILE).
    ycat = jnp.concatenate([y2, y3, y4, y5], axis=1)
    acc = acc + jnp.dot(ycat, kt_ref[...], preferred_element_type=jnp.float32)

    o_ref[0] = acc  # unmasked, lane-dense store (last dim = TILE)


def fc_forward(x1, x2, x3, x4, x5, w1, w2, w3, w4, w5):
    """Pallas implementation of FC.forward. Inputs xN are NCHW float32; weights wN
    have PyTorch Conv2d shape (2, C_in, 1, 1). Returns NCHW (N, 2, H, W)."""
    xs = [x1, x2, x3, x4, x5]
    ws = [w1, w2, w3, w4, w5]
    N, _, H, W = x1.shape
    HW = H * W

    # Channels-first flatten: NCHW -> (N, C_i, h_i*w_i). Contiguous reshape only.
    flat, hw_sizes, c_sizes = [], [], []
    for x in xs:
        n, c, h, w = x.shape
        flat.append(x.reshape(n, c, h * w).astype(jnp.float32))
        hw_sizes.append(h * w)
        c_sizes.append(c)

    # 1x1-conv weights: (2, C, 1, 1) -> (2, C). No transpose needed.
    w_mats = [w.reshape(2, -1).astype(jnp.float32) for w in ws]

    # Fused, pre-transposed bilinear upsample operator for the 4 coarse levels:
    # rows stacked as [K2^T; K3^T; K4^T; K5^T], shape (sum HW_i, HW).
    kt_blocks = []
    for x in xs[1:]:
        _, _, h, w = x.shape
        k = jnp.kron(_upsample_matrix(H, h), _upsample_matrix(W, w))  # (HW, h*w)
        kt_blocks.append(k.T)
    kt = jnp.concatenate(kt_blocks, axis=0)
    sum_hw = int(kt.shape[0])

    tile_hw = _pick_tile_hw(HW, sum_hw)
    n_hw = HW // tile_hw

    in_specs = [
        # x1 is sliced along the output HW tile; coarse x_i are whole per batch.
        pl.BlockSpec((1, c_sizes[0], tile_hw), lambda b, j: (b, 0, j)),
        pl.BlockSpec((1, c_sizes[1], hw_sizes[1]), lambda b, j: (b, 0, 0)),
        pl.BlockSpec((1, c_sizes[2], hw_sizes[2]), lambda b, j: (b, 0, 0)),
        pl.BlockSpec((1, c_sizes[3], hw_sizes[3]), lambda b, j: (b, 0, 0)),
        pl.BlockSpec((1, c_sizes[4], hw_sizes[4]), lambda b, j: (b, 0, 0)),
    ]
    for c in c_sizes:  # grid-invariant conv weights
        in_specs.append(pl.BlockSpec((2, c), lambda b, j: (0, 0)))
    in_specs.append(pl.BlockSpec((sum_hw, tile_hw), lambda b, j: (0, j)))

    out_specs = pl.BlockSpec((1, 2, tile_hw), lambda b, j: (b, 0, j))

    # Explicit scoped-VMEM budget from the actual block footprint (+ headroom for
    # double buffering), clamped to stay safe on v7x's 64 MiB VMEM.
    block_bytes = 4 * (c_sizes[0] * tile_hw + 2 * tile_hw + sum_hw * tile_hw)
    for i in range(1, 5):
        block_bytes += 4 * c_sizes[i] * hw_sizes[i]
    for c in c_sizes:
        block_bytes += 4 * 2 * c
    vmem_limit = int(min(max(4 * block_bytes, 32 << 20), 48 << 20))

    out = pl.pallas_call(
        _fc_kernel,
        out_shape=jax.ShapeDtypeStruct((N, 2, HW), jnp.float32),
        grid_spec=pltpu.PrefetchScalarGridSpec(
            num_scalar_prefetch=0,
            grid=(N, n_hw),
            in_specs=in_specs,
            out_specs=out_specs,
        ),
        compiler_params=pltpu.CompilerParams(
            dimension_semantics=("parallel", "parallel"),
            vmem_limit_bytes=vmem_limit),
    )(*flat, *w_mats, kt)

    # (N, 2, HW) -> (N, 2, H, W): pure reshape, no transpose.
    return out.reshape(N, 2, H, W)


def _reference(x1, x2, x3, x4, x5, w1, w2, w3, w4, w5):
    """Pure-JAX reference (1x1 conv + separable bilinear, align_corners=True)."""
    xs = [x1, x2, x3, x4, x5]
    ws = [w1, w2, w3, w4, w5]
    N, _, H, W = x1.shape
    acc = jnp.zeros((N, 2, H, W), jnp.float32)
    for x, w in zip(xs, ws):
        _, _, h, wd = x.shape
        y = jnp.einsum("nchw,oc->nohw", x, w.reshape(2, -1))
        uh = _upsample_matrix(H, h)
        uw = _upsample_matrix(W, wd)
        y = jnp.einsum("Hh,nohw,Ww->noHW", uh, y, uw)
        acc = acc + y
    return acc


if __name__ == "__main__":
    key = jax.random.PRNGKey(0)
    N, H, W = 2, 16, 16
    channels = [4, 4, 8, 8, 16]
    factors = [1, 2, 4, 8, 16]

    keys = jax.random.split(key, 10)
    xs = []
    for i, (c, f) in enumerate(zip(channels, factors)):
        xs.append(jax.random.normal(keys[i], (N, c, H // f, W // f), jnp.float32))
    ws = []
    for i, c in enumerate(channels):
        ws.append(jax.random.normal(keys[5 + i], (2, c, 1, 1), jnp.float32) * 0.1)

    out = fc_forward(*xs, *ws)
    out = jax.block_until_ready(out)

    ref = _reference(*xs, *ws)
    assert out.shape == (N, 2, H, W), out.shape
    assert jnp.allclose(out, ref, atol=1e-4, rtol=1e-4), float(jnp.max(jnp.abs(out - ref)))

    print("KERNEL_OK")
</pallas_src>

<mosaic_0001>
module attributes {stable_mosaic.version = 11 : i64} {
  func.func @_fc_kernel(%arg0: i32, %arg1: i32, %arg2: memref<1x4x256xf32, #tpu.memory_space<vmem>>, %arg3: memref<1x4x64xf32, #tpu.memory_space<vmem>>, %arg4: memref<1x8x16xf32, #tpu.memory_space<vmem>>, %arg5: memref<1x8x4xf32, #tpu.memory_space<vmem>>, %arg6: memref<1x16x1xf32, #tpu.memory_space<vmem>>, %arg7: memref<2x4xf32, #tpu.memory_space<vmem>>, %arg8: memref<2x4xf32, #tpu.memory_space<vmem>>, %arg9: memref<2x8xf32, #tpu.memory_space<vmem>>, %arg10: memref<2x8xf32, #tpu.memory_space<vmem>>, %arg11: memref<2x16xf32, #tpu.memory_space<vmem>>, %arg12: memref<85x256xf32, #tpu.memory_space<vmem>>, %arg13: memref<1x2x256xf32, #tpu.memory_space<vmem>>) attributes {dimension_semantics = [#tpu.dimension_semantics<parallel>, #tpu.dimension_semantics<parallel>], iteration_bounds = array<i64: 2, 1>, scalar_prefetch = 0 : i64, scratch_operands = 0 : i64, tpu.core_type = #tpu.core_type<tc>, window_params = [{transform_indices = @transform_0, window_bounds = array<i64: 1, 4, 256>}, {transform_indices = @transform_1, window_bounds = array<i64: 1, 4, 64>}, {transform_indices = @transform_2, window_bounds = array<i64: 1, 8, 16>}, {transform_indices = @transform_3, window_bounds = array<i64: 1, 8, 4>}, {transform_indices = @transform_4, window_bounds = array<i64: 1, 16, 1>}, {pipeline_mode = #tpu.pipeline_mode<synchronous>, transform_indices = @transform_5, window_bounds = array<i64: 2, 4>}, {pipeline_mode = #tpu.pipeline_mode<synchronous>, transform_indices = @transform_6, window_bounds = array<i64: 2, 4>}, {pipeline_mode = #tpu.pipeline_mode<synchronous>, transform_indices = @transform_7, window_bounds = array<i64: 2, 8>}, {pipeline_mode = #tpu.pipeline_mode<synchronous>, transform_indices = @transform_8, window_bounds = array<i64: 2, 8>}, {pipeline_mode = #tpu.pipeline_mode<synchronous>, transform_indices = @transform_9, window_bounds = array<i64: 2, 16>}, {transform_indices = @transform_10, window_bounds = array<i64: 85, 256>}, {transform_indices = @transform_11, window_bounds = array<i64: 1, 2, 256>}]} {
    %c0 = arith.constant 0 : index
    %c0_0 = arith.constant 0 : index
    %0 = vector.load %arg7[%c0, %c0_0] : memref<2x4xf32, #tpu.memory_space<vmem>>, vector<2x4xf32>
    %c0_1 = arith.constant 0 : index
    %c0_2 = arith.constant 0 : index
    %c0_3 = arith.constant 0 : index
    %1 = vector.load %arg2[%c0_1, %c0_2, %c0_3] : memref<1x4x256xf32, #tpu.memory_space<vmem>>, vector<1x4x256xf32>
    %2 = vector.shape_cast %1 : vector<1x4x256xf32> to vector<4x256xf32>
    %cst = arith.constant dense<0.000000e+00> : vector<2x256xf32>
    %3 = tpu.matmul %0, %2, %cst {dimension_numbers = #tpu.dot_dimension_numbers<[1], [0], [0], [1], [0, 0, 1, 1], [], []>} : vector<2x4xf32>, vector<4x256xf32>, vector<2x256xf32> -> vector<2x256xf32>
    %c0_4 = arith.constant 0 : index
    %c0_5 = arith.constant 0 : index
    %4 = vector.load %arg8[%c0_4, %c0_5] : memref<2x4xf32, #tpu.memory_space<vmem>>, vector<2x4xf32>
    %c0_6 = arith.constant 0 : index
    %c0_7 = arith.constant 0 : index
    %c0_8 = arith.constant 0 : index
    %5 = vector.load %arg3[%c0_6, %c0_7, %c0_8] : memref<1x4x64xf32, #tpu.memory_space<vmem>>, vector<1x4x64xf32>
    %6 = vector.shape_cast %5 : vector<1x4x64xf32> to vector<4x64xf32>
    %cst_9 = arith.constant dense<0.000000e+00> : vector<2x64xf32>
    %7 = tpu.matmul %4, %6, %cst_9 {dimension_numbers = #tpu.dot_dimension_numbers<[1], [0], [0], [1], [0, 0, 1, 1], [], []>} : vector<2x4xf32>, vector<4x64xf32>, vector<2x64xf32> -> vector<2x64xf32>
    %c0_10 = arith.constant 0 : index
    %c0_11 = arith.constant 0 : index
    %8 = vector.load %arg9[%c0_10, %c0_11] : memref<2x8xf32, #tpu.memory_space<vmem>>, vector<2x8xf32>
    %c0_12 = arith.constant 0 : index
    %c0_13 = arith.constant 0 : index
    %c0_14 = arith.constant 0 : index
    %9 = vector.load %arg4[%c0_12, %c0_13, %c0_14] : memref<1x8x16xf32, #tpu.memory_space<vmem>>, vector<1x8x16xf32>
    %10 = vector.shape_cast %9 : vector<1x8x16xf32> to vector<8x16xf32>
    %cst_15 = arith.constant dense<0.000000e+00> : vector<2x16xf32>
    %11 = tpu.matmul %8, %10, %cst_15 {dimension_numbers = #tpu.dot_dimension_numbers<[1], [0], [0], [1], [0, 0, 1, 1], [], []>} : vector<2x8xf32>, vector<8x16xf32>, vector<2x16xf32> -> vector<2x16xf32>
    %c0_16 = arith.constant 0 : index
    %c0_17 = arith.constant 0 : index
    %12 = vector.load %arg10[%c0_16, %c0_17] : memref<2x8xf32, #tpu.memory_space<vmem>>, vector<2x8xf32>
    %c0_18 = arith.constant 0 : index
    %c0_19 = arith.constant 0 : index
    %c0_20 = arith.constant 0 : index
    %13 = vector.load %arg5[%c0_18, %c0_19, %c0_20] : memref<1x8x4xf32, #tpu.memory_space<vmem>>, vector<1x8x4xf32>
    %14 = vector.shape_cast %13 : vector<1x8x4xf32> to vector<8x4xf32>
    %cst_21 = arith.constant dense<0.000000e+00> : vector<2x4xf32>
    %15 = tpu.matmul %12, %14, %cst_21 {dimension_numbers = #tpu.dot_dimension_numbers<[1], [0], [0], [1], [0, 0, 1, 1], [], []>} : vector<2x8xf32>, vector<8x4xf32>, vector<2x4xf32> -> vector<2x4xf32>
    %c0_22 = arith.constant 0 : index
    %c0_23 = arith.constant 0 : index
    %16 = vector.load %arg11[%c0_22, %c0_23] : memref<2x16xf32, #tpu.memory_space<vmem>>, vector<2x16xf32>
    %c0_24 = arith.constant 0 : index
    %c0_25 = arith.constant 0 : index
    %c0_26 = arith.constant 0 : index
    %17 = vector.load %arg6[%c0_24, %c0_25, %c0_26] : memref<1x16x1xf32, #tpu.memory_space<vmem>>, vector<1x16x1xf32>
    %18 = vector.shape_cast %17 : vector<1x16x1xf32> to vector<16x1xf32>
    %cst_27 = arith.constant dense<0.000000e+00> : vector<2x1xf32>
    %19 = tpu.matmul %16, %18, %cst_27 {dimension_numbers = #tpu.dot_dimension_numbers<[1], [0], [0], [1], [0, 0, 1, 1], [], []>} : vector<2x16xf32>, vector<16x1xf32>, vector<2x1xf32> -> vector<2x1xf32>
    %20 = tpu.concatenate %7, %11, %15, %19 in 1 : vector<2x64xf32>, vector<2x16xf32>, vector<2x4xf32>, vector<2x1xf32> -> vector<2x85xf32>
    %c0_28 = arith.constant 0 : index
    %c0_29 = arith.constant 0 : index
    %21 = vector.load %arg12[%c0_28, %c0_29] : memref<85x256xf32, #tpu.memory_space<vmem>>, vector<85x256xf32>
    %cst_30 = arith.constant dense<0.000000e+00> : vector<2x256xf32>
    %22 = tpu.matmul %20, %21, %cst_30 {dimension_numbers = #tpu.dot_dimension_numbers<[1], [0], [0], [1], [0, 0, 1, 1], [], []>} : vector<2x85xf32>, vector<85x256xf32>, vector<2x256xf32> -> vector<2x256xf32>
    %23 = arith.addf %3, %22 : vector<2x256xf32>
    %c0_31 = arith.constant 0 : index
    %c0_32 = arith.constant 0 : index
    %c0_33 = arith.constant 0 : index
    %24 = vector.load %arg13[%c0_31, %c0_32, %c0_33] : memref<1x2x256xf32, #tpu.memory_space<vmem>>, vector<1x2x256xf32>
    %25 = vector.shape_cast %24 : vector<1x2x256xf32> to vector<2x256xf32>
    %26 = vector.shape_cast %23 : vector<2x256xf32> to vector<1x2x256xf32>
    tpu.vector_store %arg13[%c0_31, %c0_32, %c0_33], %26 {strides = array<i32>} : memref<1x2x256xf32, #tpu.memory_space<vmem>>, vector<1x2x256xf32>,
    return
  }
  func.func @transform_0(%arg0: i32, %arg1: i32) -> (i32, i32, i32) {
    %c0_i32 = arith.constant 0 : i32
    %c0_i32_0 = arith.constant 0 : i32
    return %arg0, %c0_i32, %arg1 : i32, i32, i32
  }
  func.func @transform_1(%arg0: i32, %arg1: i32) -> (i32, i32, i32) {
    %c0_i32 = arith.constant 0 : i32
    %c0_i32_0 = arith.constant 0 : i32
    %c0_i32_1 = arith.constant 0 : i32
    return %arg0, %c0_i32, %c0_i32_0 : i32, i32, i32
  }
  func.func @transform_2(%arg0: i32, %arg1: i32) -> (i32, i32, i32) {
    %c0_i32 = arith.constant 0 : i32
    %c0_i32_0 = arith.constant 0 : i32
    %c0_i32_1 = arith.constant 0 : i32
    return %arg0, %c0_i32, %c0_i32_0 : i32, i32, i32
  }
  func.func @transform_3(%arg0: i32, %arg1: i32) -> (i32, i32, i32) {
    %c0_i32 = arith.constant 0 : i32
    %c0_i32_0 = arith.constant 0 : i32
    %c0_i32_1 = arith.constant 0 : i32
    return %arg0, %c0_i32, %c0_i32_0 : i32, i32, i32
  }
  func.func @transform_4(%arg0: i32, %arg1: i32) -> (i32, i32, i32) {
    %c0_i32 = arith.constant 0 : i32
    %c0_i32_0 = arith.constant 0 : i32
    %c0_i32_1 = arith.constant 0 : i32
    return %arg0, %c0_i32, %c0_i32_0 : i32, i32, i32
  }
  func.func @transform_5(%arg0: i32, %arg1: i32) -> (i32, i32) {
    %c0_i32 = arith.constant 0 : i32
    %c0_i32_0 = arith.constant 0 : i32
    %c0_i32_1 = arith.constant 0 : i32
    return %c0_i32, %c0_i32_0 : i32, i32
  }
  func.func @transform_6(%arg0: i32, %arg1: i32) -> (i32, i32) {
    %c0_i32 = arith.constant 0 : i32
    %c0_i32_0 = arith.constant 0 : i32
    %c0_i32_1 = arith.constant 0 : i32
    return %c0_i32, %c0_i32_0 : i32, i32
  }
  func.func @transform_7(%arg0: i32, %arg1: i32) -> (i32, i32) {
    %c0_i32 = arith.constant 0 : i32
    %c0_i32_0 = arith.constant 0 : i32
    %c0_i32_1 = arith.constant 0 : i32
    return %c0_i32, %c0_i32_0 : i32, i32
  }
  func.func @transform_8(%arg0: i32, %arg1: i32) -> (i32, i32) {
    %c0_i32 = arith.constant 0 : i32
    %c0_i32_0 = arith.constant 0 : i32
    %c0_i32_1 = arith.constant 0 : i32
    return %c0_i32, %c0_i32_0 : i32, i32
  }
  func.func @transform_9(%arg0: i32, %arg1: i32) -> (i32, i32) {
    %c0_i32 = arith.constant 0 : i32
    %c0_i32_0 = arith.constant 0 : i32
    %c0_i32_1 = arith.constant 0 : i32
    return %c0_i32, %c0_i32_0 : i32, i32
  }
  func.func @transform_10(%arg0: i32, %arg1: i32) -> (i32, i32) {
    %c0_i32 = arith.constant 0 : i32
    %c0_i32_0 = arith.constant 0 : i32
    return %c0_i32, %arg1 : i32, i32
  }
  func.func @transform_11(%arg0: i32, %arg1: i32) -> (i32, i32, i32) {
    %c0_i32 = arith.constant 0 : i32
    %c0_i32_0 = arith.constant 0 : i32
    return %arg0, %c0_i32, %arg1 : i32, i32, i32
  }
}

</mosaic_0001>

<bundles_post_ra>
// kernel: tpu_custom_call.1
= control target key start
LH: loop header
LB: loop body
LE: loop exit
PB: predicated region body
PF: predicated region fallthrough
CT: control target
= control target key end

     0   :  { %s1668_s0 = inlined_call_operand.vmem [shape: f32[2,4,256], index: 0, kind: input, shape index: {}]   ;;  %s1669_s1 = inlined_call_operand.vmem [shape: f32[2,4,64], index: 1, kind: input, shape index: {}]   ;;  %s1670_s2 = inlined_call_operand.vmem [shape: f32[2,8,16], index: 2, kind: input, shape index: {}]   ;;  %s1671_s3 = inlined_call_operand.vmem [shape: f32[2,8,4], index: 3, kind: input, shape index: {}]   ;;  %s1672_s4 = inlined_call_operand.vmem [shape: f32[2,16,1], index: 4, kind: input, shape index: {}]   ;;  %s1673_s5 = inlined_call_operand.vmem [shape: f32[2,4], index: 5, kind: input, shape index: {}]   ;;  %s1674_s6 = inlined_call_operand.vmem [shape: f32[2,4], index: 6, kind: input, shape index: {}]   ;;  %s1675_s7 = inlined_call_operand.vmem [shape: f32[2,8], index: 7, kind: input, shape index: {}]   ;;  %s1676_s8 = inlined_call_operand.vmem [shape: f32[2,8], index: 8, kind: input, shape index: {}]   ;;  %s1677_s9 = inlined_call_operand.vmem [shape: f32[2,16], index: 9, kind: input, shape index: {}]   ;;  %s1678_s10 = inlined_call_operand.hbm [shape: f32[85,256], index: 10, kind: input, shape index: {}]   ;;  %s1679_s11 = inlined_call_operand.hbm [shape: f32[2,2,256], index: 11, kind: output, shape index: {}]  }
   0x1   :  { %1682 = sst [smem:[#allocation11_spill]] %s1678_s10 }
   0x2   :  { %16 = vsyncpa [#allocation3], 0 }
   0x3   :  { %17 = vsyncpa [#allocation4], 0 }
   0x4   :  { %19 = vsyncpa [#allocation4 + $0x1], 0  ;;  %s1507_s17 = smov 0   ;;  %s1509_s18 = smov 0  }
   0x5   :  { %s1511_s19 = smov 0   ;;  %s1513_s20 = smov 0  }
   0x6   :  { %s1515_s21 = smov 0   ;;  %s1517_s22 = smov 0  }
   0x7 LB: > { %1683 = sst [smem:[#allocation8_spill]] %s1432_s21  ;;  %s1190_s23 = sadd.s32 4294967295, %s1436_s22   ;;  %s1436_s22 = sphi %s1517_s22, %s25_s22   ;;  %s1432_s21 = sphi %s1515_s21, %s1693_s21   ;;  %s1428_s20 = sphi %s1513_s20, %s1692_s20   ;;  %s1424_s19 = sphi %s1511_s19, %s1696_s19   ;;  %s1420_s18 = sphi %s1509_s18, %s1695_s18   ;;  %s1416_s17 = sphi %s1507_s17, %s1694_s17  }
   0x8   : > { %s1191_s24 = sadd.s32 4294967294, %s1436_s22   ;;  %s37_s25 = sadd.s32 1, %s1432_s21 }
   0x9   : > { %s309_s26 = sadd.s32 1, %s1424_s19  ;;  %p39_p0 = scmp.ge.s32.totalorder %s37_s25, 2 }
   0xa   : > { %p319_p1 = scmp.ne.s32.totalorder %s1424_s19, %s1420_s18  ;;  %p320_p2 = scmp.eq.s32.totalorder %s1190_s23, 1 }
   0xb   : > { %p325_p3 = scmp.ne.s32.totalorder %s1420_s18, %s1416_s17  ;;  %s1698_s25 = smov (%p39_p0, %s37_s25), 0 }
   0xc   : > { %1684 = sst [smem:[#allocation9_spill]] %s1698_s25  ;;  %p1547_p4 = por %p320_p2, %p319_p1 }
   0xd   : > { %p326_p5 = scmp.eq.s32.totalorder %s1191_s24, 1  ;;  %s304_s28 = ssub.s32 %s1432_s21, %s1698_s25 }
   0xe   : > { %p1192_p6 = scmp.ge.s32.totalorder %s1436_s22, 1  ;;  %p307_p7 = scmp.eq.s32.totalorder %s304_s28, 0 }
   0xf   : > { %p1554_p8 = por %p326_p5, %p325_p3  ;;  %p333_p9 = scmp.lt.s32.totalorder %s1436_s22, 3 }
  0x10   : > { %s1560_s30 = scalar_select %p307_p7, %s1424_s19, %s309_s26  }
  0x11   : > { %p1562_p10 = pnand %p1192_p6, %p333_p9  ;;  %p1566_p11 = scmp.eq.s32.totalorder %s1190_s23, 0 }
  0x12   : > { %1687 = sst [smem:[#allocation10_spill]] %s1560_s30  ;;  %s1438_s14 = smov [#allocation2]  }
  0x13   : > { %p1262_p12 = pneg %p1562_p10  ;;  %s363_s15 = sshll.u32 %s1438_s14, 4  ;;  %s364_s15 = int_to_ptr.vmem [resolvable:$true] %s363_s15 }
  0x14   : > { %s1341_s16 = scalar_lea.vmem %s364_s15, 2816  ;;  %p1349_p5 = scmp.lt.s32.totalorder %s364_s15, %s364_s15 }
  0x15   : > { %p1263_p13 = pnand %p1566_p11, %p1262_p12  ;;  %p1342_p1 = scmp.ne.s32.totalorder %s364_s15, %s1341_s16 }
  0x16   : > { %p1350_p6 = scmp.lt.s32.totalorder %s1341_s16, %s1341_s16 }
  0x17   : > { %p1332_p0 = pneg %p1263_p13 }
  0x18   : > { %p1351_p7 = por %p1350_p6, %p1349_p5 }
  0x19   : > { %p1344_p2 = pnand %p1342_p1, %p1332_p0 }
  0x1b   : > { %p1345_p3 = pneg %p1344_p2 }
  0x1d   : > { %p1352_p9 = pnand %p1351_p7, %p1345_p3 }
  0x1f   : > { %1355 = shalt.err (!%p1352_p9)
}
  0x20   : > { %s1439_s23 = smov 256   ;;  %s1440_s24 = smov 16  }
  0x21   : > { %s1690_s10 = sld [smem:[#allocation11_spill]] }
  0x23   : > { %421 = sbr.rel (%p1562_p10) target bundleno = 582 (0x246), region = 64 }
  0x27   : > { %1265 = dma.hbm_to_vmem [thread:$0]  (!%p1263_p13), %s1690_s10, 2816, %s364_s15, [#allocation3], %s1439_s23, %s1439_s23, %s1440_s24  }
  0x28   : > { %1407 = dma.done.wait (%p1566_p11), [#allocation3], 2816  }
  0x29   : > { %1409 = vsyncadd (%p1566_p11), [#allocation3], 4294964480  ;;  %p483_p12 = scmp.lt.s32.totalorder %s1428_s20, 1  ;;  %v1441_v0 = vmov 0.0   ;;  %vm1442_vm0 = vmmov 0   ;;  %vm519_vm1 = vcmask 1043456  }
  0x2a   : > { %1234 = vmatprep.subr.mxu1 %v1441_v0  ;;  %1236 = vmatprep.mubr.msk.f32.mxu1 %vm1442_vm0, %v1441_v0  ;;  %vm515_vm2 = vcmask 31744   ;;  %v513_v2 = vld [vmem:[%s1674_s6] sm:$0x3]  ;;  %vm595_vm3 = vcmask 64512   ;;  %vm747_vm4 = vcmask 130048   ;;  %vm865_vm5 = vcmask 1044480  }
  0x2b   : > { %s484_s14 = scalar_select %p483_p12, %s1428_s20, 1  ;;  %936 = vmatprep.mubr.f32.mxu0 %v1441_v0  ;;  %v593_v4 = vld [vmem:[%s1675_s7] sm:$0x3]  ;;  %v860_v10 = vld [vmem:[#allocation2 + $0xa8] sm:$0x1f]  ;;  %v858_v12 = vld [vmem:[#allocation2 + $0x98] sm:$0xff] }
  0x2c   : > { %v669_v6 = vld [vmem:[%s1676_s8] sm:$0x3]  ;;  %1210 = vmatprep.subr.msk.mxu0 %vm865_vm5, %v860_v10  ;;  %v857_v13 = vld [vmem:[#allocation2 + $0x90] sm:$0xff]  ;;  %v856_v14 = vld [vmem:[#allocation2 + $0x88] sm:$0xff]  ;;  %s1444_s10 = smov 80   ;;  %s1445_s25 = smov 84  }
  0x2d   : > { %s1200_s15 = sshll.u32 %s484_s14, 2  ;;  %s1586_s16 = sshll.u32 %s484_s14, 3  ;;  %v744_v9 = vld [vmem:[%s1677_s9] sm:$0x3]  ;;  %v854_v16 = vld [vmem:[#allocation2 + $0x78] sm:$0xff]  ;;  %v853_v17 = vld [vmem:[#allocation2 + $0x70] sm:$0xff] }
  0x2e   : > { %s495_s13 = scalar_lea.vmem %s1669_s1, %s1200_s15  ;;  %s499_s28 = scalar_lea.vmem %s1670_s2, %s1586_s16  ;;  %v859_v11 = vld [vmem:[#allocation2 + $0xa0] sm:$0x1f]  ;;  %v852_v18 = vld [vmem:[#allocation2 + $0x68] sm:$0xff]  ;;  %v850_v20 = vld [vmem:[#allocation2 + $0x58] sm:$0xff]  ;;  %vm833_vm6 = vcmask 523264   ;;  %vm835_vm7 = vcmask 654336  }
  0x2f   : > { %v514_v1 = vld [vmem:[%s495_s13] sm:$0xf]  ;;  %s503_s12 = scalar_lea.vmem %s1671_s3, %s1586_s16  ;;  %s1223_s15 = sshll.u32 %s484_s14, 4  ;;  %1211 = vmatpush1.msk.msra.mxu0 %vm865_vm5, %v859_v11  ;;  %v849_v21 = vld [vmem:[#allocation2 + $0x50] sm:$0xff]  ;;  %v848_v22 = vld [vmem:[#allocation2 + $0x48] sm:$0xff]  ;;  %vm837_vm8 = vcmask 687104  }
  0x30   : > { %v594_v3 = vld [vmem:[%s499_s28] sm:$0xff]  ;;  %1235 = vmatpush3.msk.msra.mxu1 %vm519_vm1, %v514_v1  ;;  %s508_s24 = scalar_lea.vmem %s1672_s4, %s1223_s15  ;;  %884 = vmatprep.subr.mxu0 %v858_v12  ;;  %s490_s15 = scalar_lea.vmem %s1668_s0, %s1586_s16  ;;  %v846_v24 = vld [vmem:[#allocation2 + $0x38] sm:$0xff]  ;;  %v845_v25 = vld [vmem:[#allocation2 + $0x30] sm:$0xff]  ;;  %vm861_vm9 = vcmask 695296  }
  0x31   : > { %1237 = vmatmul.mubr.msk.f32.vlgmr.msra.gmra.mxu1 %vm515_vm2, %v513_v2  ;;  %1239 = vmatprep.subr.mxu1 %v1441_v0  ;;  %v670_v5 = vld [vmem:[%s503_s12] sm:$0xff]  ;;  %v746_v7 = vld [vmem:[%s508_s24 + $0x8] sm:$0xff]  ;;  %v842_v30 = vld [vmem:[#allocation2 + $0x18] sm:$0xff]  ;;  %s1443_s13 = smov 64   ;;  %s1224_s30 = sshll.u32 %s1428_s20, 6 }
  0x32   : > { %1240 = vmatpush3.msra.mxu1 %v594_v3  ;;  %1241 = vmatprep.mubr.msk.f32.mxu1 %vm1442_vm0, %v1441_v0  ;;  %v745_v8 = vld [vmem:[%s508_s24] sm:$0xff]  ;;  %v844_v26 = vld [vmem:[#allocation2 + $0x28] sm:$0xff]  ;;  %v841_v31 = vld [vmem:[#allocation2 + $0x10] sm:$0xff]  ;;  %s479_s24 = sand.u32 1, %s1420_s18  }
  0x33   : > { %1244 = vmatprep.subr.mxu1 %v1441_v0  ;;  %v855_v15 = vld [vmem:[#allocation2 + $0x80] sm:$0xff]  ;;  %885 = vmatpush1.msra.mxu0 %v857_v13  ;;  %v840_v32 = vld [vmem:[#allocation2 + $0x8] sm:$0xff]  ;;  %s1197_s21 = sshll.u32 %s479_s24, 2  ;;  %s1036_s16 = scalar_lea.sflag [#allocation4], %s479_s24 }
  0x34   : > { %886 = vmatprep.subr.mxu0 %v856_v14  ;;  %v851_v19 = vld [vmem:[#allocation2 + $0x60] sm:$0xff]  ;;  %s481_s14 = scalar_lea.vmem [#allocation5], %s1197_s21 }
  0x35   : > { %1242 = vmatmul.mubr.msk.f32.vlgmr.msra.gmra.mxu1 %vm595_vm3, %v593_v4  ;;  %887 = vmatpush1.msra.mxu0 %v855_v15  ;;  %v847_v23 = vld [vmem:[#allocation2 + $0x40] sm:$0xff]  ;;  %s1052_s26 = sshll.u32 %s481_s14, 4  ;;  %s1053_s26 = int_to_ptr.vmem [resolvable:$true] %s1052_s26 }
  0x36   : > { %1245 = vmatpush3.msra.mxu1 %v670_v5  ;;  %1246 = vmatprep.mubr.msk.f32.mxu1 %vm1442_vm0, %v1441_v0  ;;  %v512_v27 = vld [vmem:[%s490_s15] sm:$0xff]  ;;  %s1050_s15 = scalar_lea.hbm %s1679_s11, %s1224_s30  ;;  %s1356_s23 = scalar_lea.vmem %s1053_s26, 64 }
  0x37   : > { %1249 = vmatprep.subr.mxu1 %v1441_v0  ;;  %888 = vmatprep.subr.mxu0 %v854_v16  ;;  %v843_v28 = vld [vmem:[#allocation2 + $0x20] sm:$0xff]  ;;  %v944_v29 = vcombine.high %v512_v27, %v512_v27  ;;  %p1357_p10 = scmp.ne.s32.totalorder %s1053_s26, %s1356_s23 }
  0x38   : > { %889 = vmatpush1.msra.mxu0 %v853_v17  ;;  %v511_v33 = vld [vmem:[%s1673_s5] sm:$0x3] }
  0x39   : > { %1247 = vmatmul.mubr.msk.f32.vlgmr.msra.gmra.mxu1 %vm595_vm3, %v669_v6  ;;  %890 = vmatprep.subr.mxu0 %v852_v18  ;;  %v839_v34 = vld [vmem:[#allocation2] sm:$0xff]  ;;  %p1358_p11 = pnand %p1357_p10, %p1547_p4 }
  0x3a   : > { %1250 = vmatpush3.msra.mxu1 %v746_v7  ;;  %1253 = vmatprep.mubr.msk.f32.mxu1 %vm1442_vm0, %v1441_v0 }
  0x3b   : > { %1251 = vmatprep.subr.mxu1 %v1441_v0  ;;  %891 = vmatpush1.msra.mxu0 %v851_v19  ;;  %p1359_p13 = pneg %p1358_p11 }
  0x3c   : > { %1252 = vmatpush3.msra.mxu1 %v745_v8  ;;  %892 = vmatprep.subr.mxu0 %v850_v20 }
  0x3d   : > { %1254 = vmatmul.mubr.msk.f32.vlgmr.msra.gmra.mxu1 %vm747_vm4, %v744_v9  ;;  %893 = vmatpush1.msra.mxu0 %v849_v21 }
  0x3e   : > { %1016 = vmatprep.mubr.f32.mxu1 %v1441_v0  ;;  %894 = vmatprep.subr.mxu0 %v848_v22 }
  0x3f   : > { %895 = vmatpush1.msra.mxu0 %v847_v23  ;;  %1213 = vmatprep.subr.msk.mxu1 %vm519_vm1, %v944_v29 }
  0x40   : > { %896 = vmatprep.subr.mxu0 %v846_v24  ;;  %1214 = vmatpush1.msk.msra.mxu1 %vm519_vm1, %v512_v27 }
  0x41   : > { %897 = vmatpush1.msra.mxu0 %v845_v25  ;;  %1215 = vmatmul.mubr.msk.f32.vlgmr.msra.gmra.mxu1 %vm515_vm2, %v511_v33 }
  0x42   : > { %898 = vmatprep.subr.mxu0 %v844_v26 }
  0x43   : > { %899 = vmatpush1.msra.mxu0 %v843_v28 }
  0x44   : > { %900 = vmatprep.subr.mxu0 %v842_v30 }
  0x45   : > { %901 = vmatpush1.msra.mxu0 %v841_v31 }
  0x46   : > { %902 = vmatprep.subr.mxu0 %v840_v32 }
  0x47   : > { %903 = vmatpush1.msra.mxu0 %v839_v34 }
  0xf1   : > { %v589_v35 = vpop.f32.mrf.mxu1 }
  0xf3   : > { %v1238_v36 = vpop.f32.mrf.mxu1 }
  0xf5   : > { %v665_v37 = vpop.f32.mrf.mxu1 }
  0xf6   : > { %822 = vrot.lane.b32.xlu0 %v665_v37, %s1443_s13  ;;  %s1446_s13 = smov [#allocation5]  }
  0xf7   : > { %v1243_v38 = vpop.f32.mrf.mxu1 }
  0xf9   : > { %v740_v39 = vpop.f32.mrf.mxu1 }
  0xfa   : > { %826 = vrot.lane.b32.xlu0 %v740_v39, %s1444_s10  ;;  %s1360_s10 = sshll.u32 %s1446_s13, 4  ;;  %s1361_s10 = int_to_ptr.vmem [resolvable:$false] %s1360_s10 }
  0xfb   : > { %v1248_v40 = vpop.f32.mrf.mxu1  ;;  %s1362_s20 = scalar_lea.vmem %s1361_s10, 128  ;;  %p1363_p0 = scmp.lt.s32.totalorder %s1053_s26, %s1361_s10 }
  0xfc   : > { %p1364_p1 = scmp.lt.s32.totalorder %s1362_s20, %s1356_s23 }
  0xfd   : > { %v817_v41 = vpop.f32.mrf.mxu1 }
  0xfe   : > { %830 = vrot.lane.b32.xlu1 %v817_v41, %s1445_s25  ;;  %p1365_p2 = por %p1364_p1, %p1363_p0 }
  0xff   : > { %v1255_v42 = vpop.f32.mrf.mxu1 }
 0x100   : > { %p1366_p3 = pnand %p1365_p2, %p1359_p13 }
 0x101   : > { %v1018_v49 = vpop.f32.mrf.mxu1 }
 0x103   : > { %v1020_v51 = vpop.f32.mrf.mxu1 }
 0x168   : > { %v823_v43 = vpop.permute.xlu0 %822 }
 0x169   : > { %v834_v45 = vsel %vm833_vm6, %v589_v35, %v823_v43 }
 0x16c   : > { %v827_v44 = vpop.permute.xlu0 %826 }
 0x16d   : > { %v836_v46 = vsel %vm835_vm7, %v834_v45, %v827_v44 }
 0x170   : > { %v831_v47 = vpop.permute.xlu1 %830 }
 0x171   : > { %v838_v48 = vsel %vm837_vm8, %v836_v46, %v831_v47 }
 0x172   : > { %1212 = vmatmul.mubr.msk.f32.vlgmr.msra.gmra.mxu0 %vm861_vm9, %v838_v48 }
 0x232   : > { %v938_v50 = vpop.f32.mrf.mxu0 }
 0x233   : > { %v1019_v53 = vadd.f32 %v1018_v49, %v938_v50 }
 0x234   : > { %v940_v52 = vpop.f32.mrf.mxu0 }
 0x235   : > { %v1021_v54 = vadd.f32 %v1020_v51, %v940_v52 }
 0x237   : > { %v1025_v55 = vcombine.low %v1019_v53, %v1021_v54 }
 0x239   : > { %1216 = vst.sshfl [vmem:[%s481_s14] sm:$0x33 pattern:$0x76325410] %v1025_v55 }
 0x23a   : > { %1369 = shalt.err (!%p1366_p3)
}
 0x23b   : > { %s1370_s25 = scalar_lea.hbm %s1050_s15, 64  ;;  %s1374_s30 = scalar_lea.hbm %s1679_s11, 128 }
 0x23c   : > { %p1371_p5 = scmp.ne.s32.totalorder %s1050_s15, %s1370_s25  ;;  %p1375_p9 = scmp.lt.s32.totalorder %s1050_s15, %s1679_s11 }
 0x23d   : > { %p1376_p12 = scmp.lt.s32.totalorder %s1374_s30, %s1370_s25 }
 0x23e   : > { %p1372_p6 = pnand %p1371_p5, %p1547_p4 }
 0x23f   : > { %p1377_p10 = por %p1376_p12, %p1375_p9 }
 0x240   : > { %p1373_p7 = pneg %p1372_p6 }
 0x242   : > { %p1378_p11 = pnand %p1377_p10, %p1373_p7 }
 0x244   : > { %1381 = shalt.err (!%p1378_p11)
}
 0x245   : > { %1260 = dma.vmem_to_hbm [thread:$0]  (%p1547_p4), %s1053_s26, 64, %s1050_s15, %s1036_s16  }
 0x246 PF: > { %p1272_p13 = scmp.ge.s32.totalorder %s1436_s22, 2  ;;  %s1064_s12 = sand.u32 1, %s1416_s17  }
 0x247   : > { %s1065_s23 = scalar_lea.sflag [#allocation4], %s1064_s12 }
 0x248   : > { %p1267_p0 = pnand %p1272_p13, %p1554_p8 }
 0x24a   : > { %p1268_p1 = pneg %p1267_p0 }
 0x24c   : > { %1411 = dma.done.wait (%p1268_p1), %s1065_s23, 64  }
 0x24d   : > { %1413 = vsyncadd (%p1268_p1), %s1065_s23, 4294967232  ;;  %s25_s22 = sadd.s32 1, %s1436_s22   ;;  %s1691_s13 = sld [smem:[#allocation10_spill]] }
 0x24e   : > { %p22_p2 = scmp.ge.s32.totalorder %s25_s22, 4   ;;  %s1692_s20 = sld [smem:[#allocation8_spill]] }
 0x24f   : > { %s1693_s21 = sld [smem:[#allocation9_spill]]  ;;  %s1694_s17 = smov %s1420_s18 }
 0x250   : > { %s1695_s18 = smov %s1424_s19  ;;  %24 = sbr.rel (!%p22_p2) target bundleno = 7 (0x7), region = 117 }
 0x253   : > { %s1696_s19 = smov %s1691_s13 }
 0x255   :  { %1070 = vsyncpa [#allocation3], 1 }
 0x256   :  { %1072 = vsyncpa [#allocation3 + $0x1], 1 }
 0x257   :  { %1073 = vsyncpa [#allocation4], 1 }
 0x258   :  { %1075 = vsyncpa [#allocation4 + $0x1], 1 }

</bundles_post_ra>
